<compile_context>
chip_gen: v6e
topology: v6e:2x2x1
jax: 0.10.0
libtpu: 0.0.40
codegen_flags: <defaults>
</compile_context>

<pallas_src>
import functools

import jax
import jax.numpy as jnp
from jax.experimental import pallas as pl
from jax.experimental.pallas import tpu as pltpu

INPUT_DIM = 8
H1_DIM = 32
H2_DIM = 32
OUTPUT_DIM = 4
OUT_PAD = 8          # output rows padded to a full sublane group

MAX_TILE_B = 16384   # lanes per grid step (multiple of 512, per perf review)
MIN_TILE_B = 256     # single-step tile for small batches


def _round_up(n, m):
    return ((n + m - 1) // m) * m


def _pick_tile(b):
    """Lane-tile for the batch axis.

    Small batches: one step, padded to 256 lanes.
    Large batches: big tiles (amortise per-step grid overhead) but always at
    least 2 steps so both v7x TensorCores get work.
    """
    if b <= 2 * MIN_TILE_B:
        return _round_up(b, MIN_TILE_B)
    half = _round_up((b + 1) // 2, 512)
    return min(MAX_TILE_B, half)


def _use_bf16_activations():
    """bf16 tanh on v6e/v7x (bf16 EUP/VPU); f32 on v5e and older."""
    try:
        kind = jax.devices()[0].device_kind.lower()
    except Exception:
        return False
    return ("v6" in kind) or ("v7" in kind)


def _mlp_kernel(x_ref, w1_ref, b1_ref, w2_ref, b2_ref, w3_ref, b3_ref, o_ref,
                *, act_dtype):
    # x_ref: (INPUT_DIM, TILE_B) lane-major batch tile.
    # Three full-lane-width MXU matmuls (f32 accumulate), tanh on VPU/EUP in
    # act_dtype, one unmasked (OUT_PAD, TILE_B) lane/sublane-dense store.
    x = x_ref[...]
    z1 = jnp.dot(w1_ref[...], x, preferred_element_type=jnp.float32) + b1_ref[...]
    h1 = jnp.tanh(z1.astype(act_dtype))
    z2 = (jnp.dot(w2_ref[...].astype(act_dtype), h1,
                  preferred_element_type=jnp.float32) + b2_ref[...])
    h2 = jnp.tanh(z2.astype(act_dtype))
    o_ref[...] = (jnp.dot(w3_ref[...].astype(act_dtype), h2,
                          preferred_element_type=jnp.float32)
                  + b3_ref[...]).astype(o_ref.dtype)


def net_forward_t(x_t, params):
    """Feature-major entry point: x_t (INPUT_DIM, B) f32 -> (OUTPUT_DIM, B) f32."""
    w1, b1, w2, b2, w3, b3 = params
    in_dim, b = x_t.shape
    assert in_dim == INPUT_DIM

    tile_b = _pick_tile(b)
    b_pad = _round_up(b, tile_b)
    if b_pad != b:
        # Explicit zero-pad of the lane/batch tail (never rely on OOB reads).
        x_t = jnp.pad(x_t, ((0, 0), (0, b_pad - b)))

    # Zero-pad the last layer 4 -> 8 output rows: full-sublane output tiles.
    w3p = jnp.zeros((OUT_PAD, H2_DIM), w3.dtype).at[:OUTPUT_DIM].set(w3)
    b3p = jnp.zeros((OUT_PAD, 1), b3.dtype).at[:OUTPUT_DIM].set(b3)

    act_dtype = jnp.bfloat16 if _use_bf16_activations() else jnp.float32
    kernel = functools.partial(_mlp_kernel, act_dtype=act_dtype)

    grid = (b_pad // tile_b,)

    out_t = pl.pallas_call(
        kernel,
        out_shape=jax.ShapeDtypeStruct((OUT_PAD, b_pad), jnp.float32),
        grid=grid,
        in_specs=[
            # batch-tiled activation input (double-buffer pipelined)
            pl.BlockSpec((INPUT_DIM, tile_b), lambda i: (0, i)),
            # weights / biases: same block every step -> VMEM-resident
            pl.BlockSpec((H1_DIM, INPUT_DIM), lambda i: (0, 0)),
            pl.BlockSpec((H1_DIM, 1), lambda i: (0, 0)),
            pl.BlockSpec((H2_DIM, H1_DIM), lambda i: (0, 0)),
            pl.BlockSpec((H2_DIM, 1), lambda i: (0, 0)),
            pl.BlockSpec((OUT_PAD, H2_DIM), lambda i: (0, 0)),
            pl.BlockSpec((OUT_PAD, 1), lambda i: (0, 0)),
        ],
        out_specs=pl.BlockSpec((OUT_PAD, tile_b), lambda i: (0, i)),
        compiler_params=pltpu.CompilerParams(
            dimension_semantics=("parallel",),   # batch tiles across v7x's 2 TCs
            vmem_limit_bytes=48 << 20,           # headroom for 16K-lane tiles on all gens
        ),
    )(x_t, w1, b1, w2, b2, w3p, b3p)

    return out_t[:OUTPUT_DIM, :b]


def net_forward(x, params):
    """Torch-facing wrapper: x (B, INPUT_DIM) -> (B, OUTPUT_DIM).

    The two transposes are pure layout plumbing; callers that already hold
    feature-major data should use net_forward_t directly. For tiny batches
    (B <~ 256) the pallas_call is dispatch-overhead bound — prefer
    reference_forward or batch many agent steps into one call.
    """
    return net_forward_t(x.T, params).T


def init_params(key):
    """Deterministic init mimicking torch.nn.Linear default (Kaiming-uniform).

    Weights in torch layout (out_features, in_features); biases as
    (out_features, 1) columns for lane-broadcast inside the kernel.
    """
    def linear(key, fan_in, fan_out):
        kw, kb = jax.random.split(key)
        bound = 1.0 / jnp.sqrt(fan_in)
        w = jax.random.uniform(kw, (fan_out, fan_in), jnp.float32, -bound, bound)
        b = jax.random.uniform(kb, (fan_out, 1), jnp.float32, -bound, bound)
        return w, b

    k1, k2, k3 = jax.random.split(key, 3)
    w1, b1 = linear(k1, INPUT_DIM, H1_DIM)
    w2, b2 = linear(k2, H1_DIM, H2_DIM)
    w3, b3 = linear(k3, H2_DIM, OUTPUT_DIM)
    return (w1, b1, w2, b2, w3, b3)


def reference_forward(x, params):
    """Pure-JAX reference in batch-major layout (matches torch semantics)."""
    w1, b1, w2, b2, w3, b3 = params
    h1 = jnp.tanh(x @ w1.T + b1.T)
    h2 = jnp.tanh(h1 @ w2.T + b2.T)
    return h2 @ w3.T + b3.T


if __name__ == "__main__":
    key = jax.random.PRNGKey(0)
    kp, kx = jax.random.split(key)
    params = init_params(kp)

    # Tolerance: bf16 activations (v6e/v7x) relax it vs. the f32 reference.
    bf16_act = _use_bf16_activations()
    atol = rtol = (5e-2 if bf16_act else 1e-5)

    # Small demo batch consistent with the module (single 256-lane tile).
    B = 8
    x = jax.random.normal(kx, (B, INPUT_DIM), dtype=jnp.float32)
    out = jax.block_until_ready(net_forward(x, params))
    ref = reference_forward(x, params)
    assert out.shape == (B, OUTPUT_DIM)
    assert jnp.allclose(out, ref, atol=atol, rtol=rtol), float(jnp.max(jnp.abs(out - ref)))

    # Multi-tile path: B=1200 -> tile_b=1024, b_pad=2048, grid=(2,)
    # (exercises padding, pipelining, and the 2-step split for v7x's 2 TCs).
    B2 = 1200
    x2 = jax.random.normal(jax.random.PRNGKey(1), (B2, INPUT_DIM), dtype=jnp.float32)
    out2 = jax.block_until_ready(net_forward(x2, params))
    ref2 = reference_forward(x2, params)
    assert out2.shape == (B2, OUTPUT_DIM)
    assert jnp.allclose(out2, ref2, atol=atol, rtol=rtol), float(jnp.max(jnp.abs(out2 - ref2)))

    print("KERNEL_OK")
</pallas_src>

<mosaic_0001>
module attributes {stable_mosaic.version = 11 : i64} {
  func.func @_mlp_kernel(%arg0: i32, %arg1: memref<8x256xf32, #tpu.memory_space<vmem>>, %arg2: memref<32x8xf32, #tpu.memory_space<vmem>>, %arg3: memref<32x1xf32, #tpu.memory_space<vmem>>, %arg4: memref<32x32xf32, #tpu.memory_space<vmem>>, %arg5: memref<32x1xf32, #tpu.memory_space<vmem>>, %arg6: memref<8x32xf32, #tpu.memory_space<vmem>>, %arg7: memref<8x1xf32, #tpu.memory_space<vmem>>, %arg8: memref<8x256xf32, #tpu.memory_space<vmem>>) attributes {dimension_semantics = [#tpu.dimension_semantics<parallel>], iteration_bounds = array<i64: 1>, scalar_prefetch = 0 : i64, scratch_operands = 0 : i64, tpu.core_type = #tpu.core_type<tc>, window_params = [{transform_indices = @transform_0, window_bounds = array<i64: 8, 256>}, {pipeline_mode = #tpu.pipeline_mode<synchronous>, transform_indices = @transform_1, window_bounds = array<i64: 32, 8>}, {pipeline_mode = #tpu.pipeline_mode<synchronous>, transform_indices = @transform_2, window_bounds = array<i64: 32, 1>}, {pipeline_mode = #tpu.pipeline_mode<synchronous>, transform_indices = @transform_3, window_bounds = array<i64: 32, 32>}, {pipeline_mode = #tpu.pipeline_mode<synchronous>, transform_indices = @transform_4, window_bounds = array<i64: 32, 1>}, {pipeline_mode = #tpu.pipeline_mode<synchronous>, transform_indices = @transform_5, window_bounds = array<i64: 8, 32>}, {pipeline_mode = #tpu.pipeline_mode<synchronous>, transform_indices = @transform_6, window_bounds = array<i64: 8, 1>}, {transform_indices = @transform_7, window_bounds = array<i64: 8, 256>}]} {
    %c0 = arith.constant 0 : index
    %c0_0 = arith.constant 0 : index
    %0 = vector.load %arg1[%c0, %c0_0] : memref<8x256xf32, #tpu.memory_space<vmem>>, vector<8x256xf32>
    %c0_1 = arith.constant 0 : index
    %c0_2 = arith.constant 0 : index
    %1 = vector.load %arg2[%c0_1, %c0_2] : memref<32x8xf32, #tpu.memory_space<vmem>>, vector<32x8xf32>
    %cst = arith.constant dense<0.000000e+00> : vector<32x256xf32>
    %2 = tpu.matmul %1, %0, %cst {dimension_numbers = #tpu.dot_dimension_numbers<[1], [0], [0], [1], [0, 0, 1, 1], [], []>} : vector<32x8xf32>, vector<8x256xf32>, vector<32x256xf32> -> vector<32x256xf32>
    %c0_3 = arith.constant 0 : index
    %c0_4 = arith.constant 0 : index
    %3 = vector.load %arg3[%c0_3, %c0_4] : memref<32x1xf32, #tpu.memory_space<vmem>>, vector<32x1xf32>
    %4 = vector.broadcast %3 : vector<32x1xf32> to vector<32x256xf32>
    %5 = arith.addf %2, %4 : vector<32x256xf32>
    %6 = math.tanh %5 : vector<32x256xf32>
    %c0_5 = arith.constant 0 : index
    %c0_6 = arith.constant 0 : index
    %7 = vector.load %arg4[%c0_5, %c0_6] : memref<32x32xf32, #tpu.memory_space<vmem>>, vector<32x32xf32>
    %cst_7 = arith.constant dense<0.000000e+00> : vector<32x256xf32>
    %8 = tpu.matmul %7, %6, %cst_7 {dimension_numbers = #tpu.dot_dimension_numbers<[1], [0], [0], [1], [0, 0, 1, 1], [], []>} : vector<32x32xf32>, vector<32x256xf32>, vector<32x256xf32> -> vector<32x256xf32>
    %c0_8 = arith.constant 0 : index
    %c0_9 = arith.constant 0 : index
    %9 = vector.load %arg5[%c0_8, %c0_9] : memref<32x1xf32, #tpu.memory_space<vmem>>, vector<32x1xf32>
    %10 = vector.broadcast %9 : vector<32x1xf32> to vector<32x256xf32>
    %11 = arith.addf %8, %10 : vector<32x256xf32>
    %12 = math.tanh %11 : vector<32x256xf32>
    %c0_10 = arith.constant 0 : index
    %c0_11 = arith.constant 0 : index
    %13 = vector.load %arg6[%c0_10, %c0_11] : memref<8x32xf32, #tpu.memory_space<vmem>>, vector<8x32xf32>
    %cst_12 = arith.constant dense<0.000000e+00> : vector<8x256xf32>
    %14 = tpu.matmul %13, %12, %cst_12 {dimension_numbers = #tpu.dot_dimension_numbers<[1], [0], [0], [1], [0, 0, 1, 1], [], []>} : vector<8x32xf32>, vector<32x256xf32>, vector<8x256xf32> -> vector<8x256xf32>
    %c0_13 = arith.constant 0 : index
    %c0_14 = arith.constant 0 : index
    %15 = vector.load %arg7[%c0_13, %c0_14] : memref<8x1xf32, #tpu.memory_space<vmem>>, vector<8x1xf32>
    %16 = vector.broadcast %15 : vector<8x1xf32> to vector<8x256xf32>
    %17 = arith.addf %14, %16 : vector<8x256xf32>
    %c0_15 = arith.constant 0 : index
    %c0_16 = arith.constant 0 : index
    %18 = vector.load %arg8[%c0_15, %c0_16] : memref<8x256xf32, #tpu.memory_space<vmem>>, vector<8x256xf32>
    tpu.vector_store %arg8[%c0_15, %c0_16], %17 {strides = array<i32>} : memref<8x256xf32, #tpu.memory_space<vmem>>, vector<8x256xf32>,
    return
  }
  func.func @transform_0(%arg0: i32) -> (i32, i32) {
    %c0_i32 = arith.constant 0 : i32
    %c0_i32_0 = arith.constant 0 : i32
    return %c0_i32, %arg0 : i32, i32
  }
  func.func @transform_1(%arg0: i32) -> (i32, i32) {
    %c0_i32 = arith.constant 0 : i32
    %c0_i32_0 = arith.constant 0 : i32
    %c0_i32_1 = arith.constant 0 : i32
    return %c0_i32, %c0_i32_0 : i32, i32
  }
  func.func @transform_2(%arg0: i32) -> (i32, i32) {
    %c0_i32 = arith.constant 0 : i32
    %c0_i32_0 = arith.constant 0 : i32
    %c0_i32_1 = arith.constant 0 : i32
    return %c0_i32, %c0_i32_0 : i32, i32
  }
  func.func @transform_3(%arg0: i32) -> (i32, i32) {
    %c0_i32 = arith.constant 0 : i32
    %c0_i32_0 = arith.constant 0 : i32
    %c0_i32_1 = arith.constant 0 : i32
    return %c0_i32, %c0_i32_0 : i32, i32
  }
  func.func @transform_4(%arg0: i32) -> (i32, i32) {
    %c0_i32 = arith.constant 0 : i32
    %c0_i32_0 = arith.constant 0 : i32
    %c0_i32_1 = arith.constant 0 : i32
    return %c0_i32, %c0_i32_0 : i32, i32
  }
  func.func @transform_5(%arg0: i32) -> (i32, i32) {
    %c0_i32 = arith.constant 0 : i32
    %c0_i32_0 = arith.constant 0 : i32
    %c0_i32_1 = arith.constant 0 : i32
    return %c0_i32, %c0_i32_0 : i32, i32
  }
  func.func @transform_6(%arg0: i32) -> (i32, i32) {
    %c0_i32 = arith.constant 0 : i32
    %c0_i32_0 = arith.constant 0 : i32
    %c0_i32_1 = arith.constant 0 : i32
    return %c0_i32, %c0_i32_0 : i32, i32
  }
  func.func @transform_7(%arg0: i32) -> (i32, i32) {
    %c0_i32 = arith.constant 0 : i32
    %c0_i32_0 = arith.constant 0 : i32
    return %c0_i32, %arg0 : i32, i32
  }
}

</mosaic_0001>

<bundles_post_ra>
// kernel: tpu_custom_call.1
= control target key start
LH: loop header
LB: loop body
LE: loop exit
PB: predicated region body
PF: predicated region fallthrough
CT: control target
= control target key end

     0   :  { %vm57_vm0 = vcmask 64512   ;;  %v470_v3 = vmov 0.0   ;;  %v471_v4 = vmov 0   ;;  %s594_s0 = inlined_call_operand.vmem [shape: f32[8,256], index: 0, kind: input, shape index: {}]   ;;  %s595_s1 = inlined_call_operand.vmem [shape: f32[32,8], index: 1, kind: input, shape index: {}]   ;;  %s596_s2 = inlined_call_operand.vmem [shape: f32[32,1], index: 2, kind: input, shape index: {}]   ;;  %s597_s3 = inlined_call_operand.vmem [shape: f32[32,32], index: 3, kind: input, shape index: {}]   ;;  %s598_s4 = inlined_call_operand.vmem [shape: f32[32,1], index: 4, kind: input, shape index: {}]   ;;  %s599_s5 = inlined_call_operand.vmem [shape: f32[8,32], index: 5, kind: input, shape index: {}]   ;;  %s600_s6 = inlined_call_operand.vmem [shape: f32[8,1], index: 6, kind: input, shape index: {}]   ;;  %s601_s7 = inlined_call_operand.hbm [shape: f32[8,256], index: 7, kind: output, shape index: {}]  }
   0x1   :  { %v28_v0 = vld [vmem:[%s594_s0 + $0x8] sm:$0xff]  ;;  %v27_v1 = vld [vmem:[%s594_s0] sm:$0xff]  ;;  %134 = vmatprep.mubr.f32.mxu0 %v470_v3  ;;  %415 = vset.pattern.permute.xlu1 %v471_v4  ;;  %v36_v5 = vld [vmem:[%s596_s2 + $0x18] sm:$0xff] }
   0x2   :  { %v29_v2 = vld [vmem:[%s595_s1] sm:$0xff]  ;;  %100 = vmatprep.subr.mxu0 %v28_v0  ;;  %v34_v6 = vld [vmem:[%s596_s2 + $0x8] sm:$0xff]  ;;  %414 = vset.pattern.permute.xlu0 %v471_v4  ;;  %v35_v8 = vld [vmem:[%s596_s2 + $0x10] sm:$0xff] }
   0x3   :  { %101 = vmatpush1.msra.mxu0 %v27_v1  ;;  %v30_v7 = vld [vmem:[%s595_s1 + $0x8] sm:$0xff]  ;;  %54 = vperm.xlu0 %414, %v36_v5  }
   0x4   :  { %402 = vmatmul.mubr.msk.f32.vlgmr.msra.gmra.mxu0 %vm57_vm0, %v29_v2  ;;  %44 = vperm.xlu1 %415, %v34_v6  }
   0x5   :  { %140 = vmatprep.mubr.f32.mxu0 %v470_v3  ;;  %272 = vmatprep.mubr.f32.mxu1 %v470_v3 }
   0x6   :  { %12 = vsyncpa [#allocation3], 0  ;;  %v33_v9 = vld [vmem:[%s596_s2] sm:$0xff]  ;;  %v31_v10 = vld [vmem:[%s595_s1 + $0x10] sm:$0xff]  ;;  %vm195_vm1 = vcmask 261120   ;;  %s472_s11 = smov [#allocation2]  }
   0x7   :  { %49 = vperm.xlu0 %414, %v35_v8   ;;  %v174_v11 = vld [vmem:[%s598_s4 + $0x18] sm:$0xff]  ;;  %v173_v12 = vld [vmem:[%s598_s4 + $0x10] sm:$0xff]  ;;  %v172_v14 = vld [vmem:[%s598_s4 + $0x8] sm:$0xff]  ;;  %s394_s12 = sshll.u32 %s472_s11, 4  ;;  %s395_s12 = int_to_ptr.vmem [resolvable:$true] %s394_s12 }
   0x8   :  { %403 = vmatmul.mubr.msk.f32.gmra.mxu0 %vm57_vm0, %v30_v7  ;;  %39 = vperm.xlu1 %415, %v33_v9   ;;  %v32_v13 = vld [vmem:[%s595_s1 + $0x18] sm:$0xff]  ;;  %v171_v15 = vld [vmem:[%s598_s4] sm:$0xff]  ;;  %v168_v46 = vld [vmem:[%s597_s3 + $0x8] sm:$0xff]  ;;  %s448_s13 = scalar_lea.vmem %s395_s12, 256  ;;  %p453_p1 = scmp.lt.s32.totalorder %s395_s12, %s395_s12 }
   0x9   :  { %146 = vmatprep.mubr.f32.mxu0 %v470_v3  ;;  %v306_v16 = vld [vmem:[%s600_s6] sm:$0xff]  ;;  %v169_v47 = vld [vmem:[%s597_s3 + $0x10] sm:$0xff]  ;;  %v170_v48 = vld [vmem:[%s597_s3 + $0x18] sm:$0xff]  ;;  %p449_p0 = scmp.ne.s32.totalorder %s395_s12, %s448_s13  ;;  %p454_p2 = scmp.lt.s32.totalorder %s448_s13, %s448_s13 }
   0xa   :  { %v167_v44 = vld [vmem:[%s597_s3] sm:$0xff] }
   0xb   :  { %192 = vperm.xlu0 %414, %v174_v11   ;;  %p455_p3 = por %p454_p2, %p453_p1 }
   0xc   :  { %404 = vmatmul.mubr.msk.f32.gmra.mxu0 %vm57_vm0, %v31_v10  ;;  %187 = vperm.xlu1 %415, %v173_v12   ;;  %v305_v12 = vld [vmem:[%s599_s5] sm:$0xff] }
   0xd   :  { %152 = vmatprep.mubr.f32.mxu0 %v470_v3  ;;  %p456_p4 = pnand %p455_p3, %p449_p0 }
   0xf   :  { %182 = vperm.xlu0 %414, %v172_v14  }
  0x10   :  { %405 = vmatmul.mubr.msk.f32.gmra.mxu0 %vm57_vm0, %v32_v13  ;;  %177 = vperm.xlu1 %415, %v171_v15  }
  0x11   :  { %379 = vmatprep.mubr.f32.mxu0 %v470_v3 }
  0x13   :  { %309 = vperm.xlu0 %414, %v306_v16  }
  0x7e   :  { %v55_v21 = vpop.permute.xlu0 %54 }
  0x7f   :  { %v45_v24 = vpop.permute.xlu1 %44 }
  0x82   :  { %v50_v26 = vpop.permute.xlu0 %49 }
  0x83   :  { %v40_v32 = vpop.permute.xlu1 %39 }
  0x86   :  { %v193_v54 = vpop.permute.xlu0 %192 }
  0x87   :  { %v188_v56 = vpop.permute.xlu1 %187 }
  0x8a   :  { %v183_v62 = vpop.permute.xlu0 %182 }
  0x8b   :  { %v178_v1 = vpop.permute.xlu1 %177 }
  0x8e   :  { %v310_v14 = vpop.permute.xlu0 %309 }
  0xc4   :  { %v136_v17 = vpop.f32.mrf.mxu0 }
  0xc5   :  { %v137_v36 = vadd.f32 %v136_v17, %v40_v32 }
  0xc6   :  { %v138_v18 = vpop.f32.mrf.mxu0 }
  0xc7   :  { %v139_v35 = vadd.f32 %v138_v18, %v40_v32 }
  0xc8   :  { %v142_v19 = vpop.f32.mrf.mxu0 }
  0xc9   :  { %v143_v34 = vadd.f32 %v142_v19, %v45_v24 }
  0xca   :  { %v144_v20 = vpop.f32.mrf.mxu0 }
  0xcb   :  { %v145_v33 = vadd.f32 %v144_v20, %v45_v24 }
  0xcc   :  { %v148_v22 = vpop.f32.mrf.mxu0 }
  0xcd   :  { %v149_v31 = vadd.f32 %v148_v22, %v50_v26 }
  0xce   :  { %v150_v23 = vpop.f32.mrf.mxu0 }
  0xcf   :  { %v151_v29 = vadd.f32 %v150_v23, %v50_v26 }
  0xd0   :  { %v154_v25 = vpop.f32.mrf.mxu0 }
  0xd1   :  { %v155_v27 = vadd.f32 %v154_v25, %v55_v21 }
  0xd2   :  { %v156_v28 = vpop.f32.mrf.mxu0 }
  0xd3   :  { %v157_v30 = vadd.f32 %v156_v28, %v55_v21 }
  0xd5   :  { %416 = vtanh.f32 %v157_v30 }
  0xd6   :  { %418 = vtanh.f32 %v155_v27 }
  0xd7   :  { %420 = vtanh.f32 %v151_v29 }
  0xd8   :  { %422 = vtanh.f32 %v149_v31 }
  0xd9   :  { %424 = vtanh.f32 %v145_v33 }
  0xda   :  { %426 = vtanh.f32 %v143_v34 }
  0xdb   :  { %428 = vtanh.f32 %v139_v35 }
  0xdc   :  { %430 = vtanh.f32 %v137_v36 }
  0xe2   :  { %v417_v37 = vpop.eup %416 }
  0xe3   :  { %v419_v38 = vpop.eup %418  ;;  %232 = vmatprep.subr.mxu1 %v417_v37 }
  0xe4   :  { %v421_v39 = vpop.eup %420  ;;  %233 = vmatpush1.msra.mxu1 %v419_v38 }
  0xe5   :  { %v423_v40 = vpop.eup %422  ;;  %234 = vmatprep.subr.mxu1 %v421_v39 }
  0xe6   :  { %v425_v41 = vpop.eup %424  ;;  %235 = vmatpush1.msra.mxu1 %v423_v40 }
  0xe7   :  { %v427_v42 = vpop.eup %426  ;;  %236 = vmatprep.subr.mxu1 %v425_v41 }
  0xe8   :  { %v429_v43 = vpop.eup %428  ;;  %237 = vmatpush1.msra.mxu1 %v427_v42 }
  0xe9   :  { %v431_v45 = vpop.eup %430  ;;  %238 = vmatprep.subr.mxu1 %v429_v43 }
  0xea   :  { %239 = vmatpush1.msra.mxu1 %v431_v45 }
  0xeb   :  { %406 = vmatmul.mubr.msk.f32.vlgmr.msra.gmra.mxu1 %vm195_vm1, %v167_v44 }
  0xec   :  { %278 = vmatprep.mubr.f32.mxu1 %v470_v3 }
  0xef   :  { %407 = vmatmul.mubr.msk.f32.gmra.mxu1 %vm195_vm1, %v168_v46 }
  0xf0   :  { %284 = vmatprep.mubr.f32.mxu1 %v470_v3 }
  0xf3   :  { %408 = vmatmul.mubr.msk.f32.gmra.mxu1 %vm195_vm1, %v169_v47 }
  0xf4   :  { %290 = vmatprep.mubr.f32.mxu1 %v470_v3 }
  0xf7   :  { %409 = vmatmul.mubr.msk.f32.gmra.mxu1 %vm195_vm1, %v170_v48 }
 0x1ab   :  { %v274_v49 = vpop.f32.mrf.mxu1 }
 0x1ac   :  { %v275_v4 = vadd.f32 %v274_v49, %v178_v1 }
 0x1ad   :  { %v276_v50 = vpop.f32.mrf.mxu1 }
 0x1ae   :  { %v277_v3 = vadd.f32 %v276_v50, %v178_v1 }
 0x1af   :  { %v280_v51 = vpop.f32.mrf.mxu1 }
 0x1b0   :  { %v281_v2 = vadd.f32 %v280_v51, %v183_v62 }
 0x1b1   :  { %v282_v52 = vpop.f32.mrf.mxu1 }
 0x1b2   :  { %v283_v0 = vadd.f32 %v282_v52, %v183_v62 }
 0x1b3   :  { %v286_v53 = vpop.f32.mrf.mxu1 }
 0x1b4   :  { %v287_v63 = vadd.f32 %v286_v53, %v188_v56 }
 0x1b5   :  { %v288_v55 = vpop.f32.mrf.mxu1 }
 0x1b6   :  { %v289_v60 = vadd.f32 %v288_v55, %v188_v56 }
 0x1b7   :  { %v292_v57 = vpop.f32.mrf.mxu1 }
 0x1b8   :  { %v293_v58 = vadd.f32 %v292_v57, %v193_v54 }
 0x1b9   :  { %v294_v59 = vpop.f32.mrf.mxu1 }
 0x1ba   :  { %v295_v61 = vadd.f32 %v294_v59, %v193_v54 }
 0x1bc   :  { %432 = vtanh.f32 %v295_v61 }
 0x1bd   :  { %434 = vtanh.f32 %v293_v58 }
 0x1be   :  { %436 = vtanh.f32 %v289_v60 }
 0x1bf   :  { %438 = vtanh.f32 %v287_v63 }
 0x1c0   :  { %440 = vtanh.f32 %v283_v0 }
 0x1c1   :  { %442 = vtanh.f32 %v281_v2 }
 0x1c2   :  { %444 = vtanh.f32 %v277_v3 }
 0x1c3   :  { %446 = vtanh.f32 %v275_v4 }
 0x1c9   :  { %v433_v5 = vpop.eup %432 }
 0x1ca   :  { %v435_v6 = vpop.eup %434  ;;  %339 = vmatprep.subr.mxu0 %v433_v5 }
 0x1cb   :  { %v437_v7 = vpop.eup %436  ;;  %340 = vmatpush1.msra.mxu0 %v435_v6 }
 0x1cc   :  { %v439_v8 = vpop.eup %438  ;;  %341 = vmatprep.subr.mxu0 %v437_v7 }
 0x1cd   :  { %v441_v9 = vpop.eup %440  ;;  %342 = vmatpush1.msra.mxu0 %v439_v8 }
 0x1ce   :  { %v443_v10 = vpop.eup %442  ;;  %343 = vmatprep.subr.mxu0 %v441_v9 }
 0x1cf   :  { %v445_v11 = vpop.eup %444  ;;  %344 = vmatpush1.msra.mxu0 %v443_v10 }
 0x1d0   :  { %v447_v13 = vpop.eup %446  ;;  %345 = vmatprep.subr.mxu0 %v445_v11 }
 0x1d1   :  { %346 = vmatpush1.msra.mxu0 %v447_v13 }
 0x1d2   :  { %410 = vmatmul.mubr.msk.f32.vlgmr.msra.gmra.mxu0 %vm195_vm1, %v305_v12 }
 0x292   :  { %v381_v15 = vpop.f32.mrf.mxu0 }
 0x293   :  { %v382_v16 = vadd.f32 %v381_v15, %v310_v14 }
 0x294   :  { %v383_v17 = vpop.f32.mrf.mxu0 }
 0x295   :  { %386 = vst [vmem:[#allocation2] sm:$0xff] %v382_v16  ;;  %v384_v18 = vadd.f32 %v383_v17, %v310_v14 }
 0x297   :  { %387 = vst [vmem:[#allocation2 + $0x8] sm:$0xff] %v384_v18 }
 0x298   :  { %459 = shalt.err (!%p456_p4)
}
 0x299   :  { %397 = dma.vmem_to_hbm [thread:$0]  %s395_s12, 256, %s601_s7, [#allocation3]  }
 0x29a   :  { %468 = dma.done.wait [#allocation3], 256  }
 0x29b   :  { %469 = vsyncadd [#allocation3], 4294967040 }
 0x29c   :  { %401 = vsyncpa [#allocation3], 1 }

</bundles_post_ra>
